<compile_context>
chip_gen: v5e
topology: v5e:2x2
jax: 0.10.0
libtpu: 0.0.40
codegen_flags: <defaults>
</compile_context>

<pallas_src>
import jax
import jax.numpy as jnp
from jax.experimental import pallas as pl
from jax.experimental.pallas import tpu as pltpu

_COMPUTE_DTYPE = jnp.bfloat16   # MXU-native; accumulation stays f32.
_TILE_B_MAX = 4096              # rows per grid step (double-buffered VMEM ~2.5 MiB,
                                # fits v5e's 16 MiB default scoped limit easily).
_MIN_GRID_STEPS = 4             # keep >=4 steps at large B so v7x's 2 TCs split work.


def _round_up(n: int, m: int) -> int:
    return ((n + m - 1) // m) * m


def _mlp_kernel(emb_ref, feat_ref, w1e_ref, w1f_ref, b1_ref,
                w2_ref, b2_ref, w3_ref, b3_ref, o_ref):
    cd = w2_ref.dtype  # bf16
    # In-kernel cast (free on VPU) — inputs arrive from HBM as f32, one pass.
    emb = emb_ref[...].astype(cd)
    feat = feat_ref[...].astype(cd)
    # Layer 1 — fused concat: emb @ W1_emb + feat @ W1_feat + b1, ReLU (f32).
    h1 = jnp.dot(emb, w1e_ref[...], preferred_element_type=jnp.float32)
    h1 = h1 + jnp.dot(feat, w1f_ref[...], preferred_element_type=jnp.float32)
    h1 = jnp.maximum(h1 + b1_ref[...], 0.0).astype(cd)
    # Layer 2
    h2 = jnp.dot(h1, w2_ref[...], preferred_element_type=jnp.float32)
    h2 = jnp.maximum(h2 + b2_ref[...], 0.0).astype(cd)
    # Layer 3 — native 32-wide output (masked store; kernel is HBM-bound, not
    # store-slot bound, so narrow lane-width is the cheaper choice).
    o_ref[...] = jnp.dot(h2, w3_ref[...], preferred_element_type=jnp.float32) + b3_ref[...]


def movie_tower_mlp(movie_embed, movie_features, w1, b1, w2, b2, w3, b3):
    """3-layer MLP of MovieTower.fc as one batch-tiled Pallas kernel."""
    B, emb_dim = movie_embed.shape
    feat_dim = movie_features.shape[1]
    d_h1 = w1.shape[1]
    d_h2 = w2.shape[1]
    d_out = w3.shape[1]

    # Big tiles amortize the ~0.35us per-step pipeline overhead; cap so the grid
    # keeps >= _MIN_GRID_STEPS steps (megacore sharding on v7x). Multiple of 8.
    tile_b = min(_TILE_B_MAX, max(8, _round_up(pl.cdiv(B, _MIN_GRID_STEPS), 8)))
    grid = (pl.cdiv(B, tile_b),)

    cd = _COMPUTE_DTYPE
    # Weights are tiny; wrapper-side cast/split is negligible glue.
    w1e = w1[:emb_dim].astype(cd)
    w1f = w1[emb_dim:].astype(cd)
    w2c = w2.astype(cd)
    w3c = w3.astype(cd)
    # Defensive reshape: accept (d,) biases (torch state_dict) or (1, d).
    b1f = jnp.asarray(b1, jnp.float32).reshape(1, d_h1)
    b2f = jnp.asarray(b2, jnp.float32).reshape(1, d_h2)
    b3f = jnp.asarray(b3, jnp.float32).reshape(1, d_out)

    def tiled(ncols):
        return pl.BlockSpec((tile_b, ncols), lambda i: (i, 0))

    def resident(shape):
        # Constant block index -> DMA'd once, stays VMEM-resident across steps.
        return pl.BlockSpec(shape, lambda i: (0, 0))

    return pl.pallas_call(
        _mlp_kernel,
        out_shape=jax.ShapeDtypeStruct((B, d_out), jnp.float32),
        grid=grid,
        in_specs=[
            tiled(emb_dim),
            tiled(feat_dim),
            resident((emb_dim, d_h1)),
            resident((feat_dim, d_h1)),
            resident((1, d_h1)),
            resident((d_h1, d_h2)),
            resident((1, d_h2)),
            resident((d_h2, d_out)),
            resident((1, d_out)),
        ],
        out_specs=pl.BlockSpec((tile_b, d_out), lambda i: (i, 0)),
        compiler_params=pltpu.CompilerParams(
            # Batch steps are independent -> shard across v7x's 2 TensorCores.
            dimension_semantics=("parallel",),
        ),
    )(
        jnp.asarray(movie_embed, jnp.float32),
        jnp.asarray(movie_features, jnp.float32),
        w1e, w1f, b1f, w2c, b2f, w3c, b3f,
    )


def movie_tower_forward(movie_id, movie_features, params):
    """Full MovieTower forward: embedding lookup (glue) + fused Pallas MLP."""
    # TODO(synk): jnp.take clamps out-of-range movie_id instead of raising like torch.
    # TODO(synk): fuse the embedding gather into the kernel (VMEM-resident table +
    #             in-kernel take) when the table is small enough; kept in XLA here
    #             for robustness across table sizes.
    movie_embed = jnp.take(params["embedding"], movie_id, axis=0)   # [B, emb_dim]
    return movie_tower_mlp(
        movie_embed, movie_features,
        params["w1"], params["b1"],
        params["w2"], params["b2"],
        params["w3"], params["b3"],
    )


def init_params(key, num_movies, movie_feature_dim, embedding_dim=32):
    """Deterministic synthetic parameters matching MovieTower.__init__ shapes."""
    ks = jax.random.split(key, 7)
    d_in = movie_feature_dim + embedding_dim

    def linear(kw, kb, fan_in, fan_out):
        # torch.nn.Linear default init: U(-1/sqrt(fan_in), 1/sqrt(fan_in))
        bound = 1.0 / jnp.sqrt(jnp.float32(fan_in))
        w = jax.random.uniform(kw, (fan_in, fan_out), jnp.float32, -bound, bound)
        b = jax.random.uniform(kb, (fan_out,), jnp.float32, -bound, bound)
        return w, b

    embedding = jax.random.normal(ks[0], (num_movies, embedding_dim), jnp.float32)
    w1, b1 = linear(ks[1], ks[2], d_in, 128)
    w2, b2 = linear(ks[3], ks[4], 128, 64)
    w3, b3 = linear(ks[5], ks[6], 64, embedding_dim)
    return {
        "embedding": embedding,
        "w1": w1, "b1": b1,
        "w2": w2, "b2": b2,
        "w3": w3, "b3": b3,
    }


if __name__ == "__main__":
    num_movies = 50
    movie_feature_dim = 16
    embedding_dim = 32
    batch = 8

    key = jax.random.PRNGKey(0)
    k_params, k_id, k_feat = jax.random.split(key, 3)

    params = init_params(k_params, num_movies, movie_feature_dim, embedding_dim)
    movie_id = jax.random.randint(k_id, (batch,), 0, num_movies, dtype=jnp.int32)
    movie_features = jax.random.normal(
        k_feat, (batch, movie_feature_dim), jnp.float32
    )

    out = movie_tower_forward(movie_id, movie_features, params)
    out = jax.block_until_ready(out)

    # Pure-f32 JAX reference of the same math (kernel feeds bf16 to the MXU with
    # f32 accumulation, so compare with a bf16-appropriate tolerance).
    x_ref = jnp.concatenate(
        [jnp.take(params["embedding"], movie_id, axis=0), movie_features], axis=1
    )
    h = jnp.maximum(x_ref @ params["w1"] + params["b1"][None, :], 0.0)
    h = jnp.maximum(h @ params["w2"] + params["b2"][None, :], 0.0)
    ref = h @ params["w3"] + params["b3"][None, :]

    assert out.shape == (batch, embedding_dim), out.shape
    assert jnp.allclose(out, ref, atol=3e-2, rtol=3e-2), float(
        jnp.max(jnp.abs(out - ref))
    )

    print("KERNEL_OK")
</pallas_src>

<mosaic_0001>
module attributes {stable_mosaic.version = 11 : i64} {
  func.func @_mlp_kernel(%arg0: i32, %arg1: memref<8x32xf32, #tpu.memory_space<vmem>>, %arg2: memref<8x16xf32, #tpu.memory_space<vmem>>, %arg3: memref<32x128xbf16, #tpu.memory_space<vmem>>, %arg4: memref<16x128xbf16, #tpu.memory_space<vmem>>, %arg5: memref<1x128xf32, #tpu.memory_space<vmem>>, %arg6: memref<128x64xbf16, #tpu.memory_space<vmem>>, %arg7: memref<1x64xf32, #tpu.memory_space<vmem>>, %arg8: memref<64x32xbf16, #tpu.memory_space<vmem>>, %arg9: memref<1x32xf32, #tpu.memory_space<vmem>>, %arg10: memref<8x32xf32, #tpu.memory_space<vmem>>) attributes {dimension_semantics = [#tpu.dimension_semantics<parallel>], iteration_bounds = array<i64: 1>, scalar_prefetch = 0 : i64, scratch_operands = 0 : i64, tpu.core_type = #tpu.core_type<tc>, window_params = [{transform_indices = @transform_0, window_bounds = array<i64: 8, 32>}, {transform_indices = @transform_1, window_bounds = array<i64: 8, 16>}, {pipeline_mode = #tpu.pipeline_mode<synchronous>, transform_indices = @transform_2, window_bounds = array<i64: 32, 128>}, {pipeline_mode = #tpu.pipeline_mode<synchronous>, transform_indices = @transform_3, window_bounds = array<i64: 16, 128>}, {pipeline_mode = #tpu.pipeline_mode<synchronous>, transform_indices = @transform_4, window_bounds = array<i64: 1, 128>}, {pipeline_mode = #tpu.pipeline_mode<synchronous>, transform_indices = @transform_5, window_bounds = array<i64: 128, 64>}, {pipeline_mode = #tpu.pipeline_mode<synchronous>, transform_indices = @transform_6, window_bounds = array<i64: 1, 64>}, {pipeline_mode = #tpu.pipeline_mode<synchronous>, transform_indices = @transform_7, window_bounds = array<i64: 64, 32>}, {pipeline_mode = #tpu.pipeline_mode<synchronous>, transform_indices = @transform_8, window_bounds = array<i64: 1, 32>}, {transform_indices = @transform_9, window_bounds = array<i64: 8, 32>}]} {
    %c0 = arith.constant 0 : index
    %c0_0 = arith.constant 0 : index
    %0 = vector.load %arg1[%c0, %c0_0] : memref<8x32xf32, #tpu.memory_space<vmem>>, vector<8x32xf32>
    %1 = arith.truncf %0 : vector<8x32xf32> to vector<8x32xbf16>
    %c0_1 = arith.constant 0 : index
    %c0_2 = arith.constant 0 : index
    %2 = vector.load %arg2[%c0_1, %c0_2] : memref<8x16xf32, #tpu.memory_space<vmem>>, vector<8x16xf32>
    %3 = arith.truncf %2 : vector<8x16xf32> to vector<8x16xbf16>
    %c0_3 = arith.constant 0 : index
    %c0_4 = arith.constant 0 : index
    %4 = vector.load %arg3[%c0_3, %c0_4] : memref<32x128xbf16, #tpu.memory_space<vmem>>, vector<32x128xbf16>
    %cst = arith.constant dense<0.000000e+00> : vector<8x128xf32>
    %5 = tpu.matmul %1, %4, %cst {dimension_numbers = #tpu.dot_dimension_numbers<[1], [0], [0], [1], [0, 0, 1, 1], [], []>} : vector<8x32xbf16>, vector<32x128xbf16>, vector<8x128xf32> -> vector<8x128xf32>
    %c0_5 = arith.constant 0 : index
    %c0_6 = arith.constant 0 : index
    %6 = vector.load %arg4[%c0_5, %c0_6] : memref<16x128xbf16, #tpu.memory_space<vmem>>, vector<16x128xbf16>
    %cst_7 = arith.constant dense<0.000000e+00> : vector<8x128xf32>
    %7 = tpu.matmul %3, %6, %cst_7 {dimension_numbers = #tpu.dot_dimension_numbers<[1], [0], [0], [1], [0, 0, 1, 1], [], []>} : vector<8x16xbf16>, vector<16x128xbf16>, vector<8x128xf32> -> vector<8x128xf32>
    %8 = arith.addf %5, %7 : vector<8x128xf32>
    %c0_8 = arith.constant 0 : index
    %c0_9 = arith.constant 0 : index
    %9 = vector.load %arg5[%c0_8, %c0_9] : memref<1x128xf32, #tpu.memory_space<vmem>>, vector<1x128xf32>
    %10 = vector.broadcast %9 : vector<1x128xf32> to vector<8x128xf32>
    %11 = arith.addf %8, %10 : vector<8x128xf32>
    %cst_10 = arith.constant 0.000000e+00 : f32
    %12 = vector.broadcast %cst_10 : f32 to vector<8x128xf32>
    %13 = arith.maximumf %11, %12 : vector<8x128xf32>
    %14 = arith.truncf %13 : vector<8x128xf32> to vector<8x128xbf16>
    %c0_11 = arith.constant 0 : index
    %c0_12 = arith.constant 0 : index
    %15 = vector.load %arg6[%c0_11, %c0_12] : memref<128x64xbf16, #tpu.memory_space<vmem>>, vector<128x64xbf16>
    %cst_13 = arith.constant dense<0.000000e+00> : vector<8x64xf32>
    %16 = tpu.matmul %14, %15, %cst_13 {dimension_numbers = #tpu.dot_dimension_numbers<[1], [0], [0], [1], [0, 0, 1, 1], [], []>} : vector<8x128xbf16>, vector<128x64xbf16>, vector<8x64xf32> -> vector<8x64xf32>
    %c0_14 = arith.constant 0 : index
    %c0_15 = arith.constant 0 : index
    %17 = vector.load %arg7[%c0_14, %c0_15] : memref<1x64xf32, #tpu.memory_space<vmem>>, vector<1x64xf32>
    %18 = vector.broadcast %17 : vector<1x64xf32> to vector<8x64xf32>
    %19 = arith.addf %16, %18 : vector<8x64xf32>
    %cst_16 = arith.constant 0.000000e+00 : f32
    %20 = vector.broadcast %cst_16 : f32 to vector<8x64xf32>
    %21 = arith.maximumf %19, %20 : vector<8x64xf32>
    %22 = arith.truncf %21 : vector<8x64xf32> to vector<8x64xbf16>
    %c0_17 = arith.constant 0 : index
    %c0_18 = arith.constant 0 : index
    %23 = vector.load %arg8[%c0_17, %c0_18] : memref<64x32xbf16, #tpu.memory_space<vmem>>, vector<64x32xbf16>
    %cst_19 = arith.constant dense<0.000000e+00> : vector<8x32xf32>
    %24 = tpu.matmul %22, %23, %cst_19 {dimension_numbers = #tpu.dot_dimension_numbers<[1], [0], [0], [1], [0, 0, 1, 1], [], []>} : vector<8x64xbf16>, vector<64x32xbf16>, vector<8x32xf32> -> vector<8x32xf32>
    %c0_20 = arith.constant 0 : index
    %c0_21 = arith.constant 0 : index
    %25 = vector.load %arg9[%c0_20, %c0_21] : memref<1x32xf32, #tpu.memory_space<vmem>>, vector<1x32xf32>
    %26 = vector.broadcast %25 : vector<1x32xf32> to vector<8x32xf32>
    %27 = arith.addf %24, %26 : vector<8x32xf32>
    %c0_22 = arith.constant 0 : index
    %c0_23 = arith.constant 0 : index
    %28 = vector.load %arg10[%c0_22, %c0_23] : memref<8x32xf32, #tpu.memory_space<vmem>>, vector<8x32xf32>
    tpu.vector_store %arg10[%c0_22, %c0_23], %27 {strides = array<i32>} : memref<8x32xf32, #tpu.memory_space<vmem>>, vector<8x32xf32>,
    return
  }
  func.func @transform_0(%arg0: i32) -> (i32, i32) {
    %c0_i32 = arith.constant 0 : i32
    %c0_i32_0 = arith.constant 0 : i32
    return %arg0, %c0_i32 : i32, i32
  }
  func.func @transform_1(%arg0: i32) -> (i32, i32) {
    %c0_i32 = arith.constant 0 : i32
    %c0_i32_0 = arith.constant 0 : i32
    return %arg0, %c0_i32 : i32, i32
  }
  func.func @transform_2(%arg0: i32) -> (i32, i32) {
    %c0_i32 = arith.constant 0 : i32
    %c0_i32_0 = arith.constant 0 : i32
    %c0_i32_1 = arith.constant 0 : i32
    return %c0_i32, %c0_i32_0 : i32, i32
  }
  func.func @transform_3(%arg0: i32) -> (i32, i32) {
    %c0_i32 = arith.constant 0 : i32
    %c0_i32_0 = arith.constant 0 : i32
    %c0_i32_1 = arith.constant 0 : i32
    return %c0_i32, %c0_i32_0 : i32, i32
  }
  func.func @transform_4(%arg0: i32) -> (i32, i32) {
    %c0_i32 = arith.constant 0 : i32
    %c0_i32_0 = arith.constant 0 : i32
    %c0_i32_1 = arith.constant 0 : i32
    return %c0_i32, %c0_i32_0 : i32, i32
  }
  func.func @transform_5(%arg0: i32) -> (i32, i32) {
    %c0_i32 = arith.constant 0 : i32
    %c0_i32_0 = arith.constant 0 : i32
    %c0_i32_1 = arith.constant 0 : i32
    return %c0_i32, %c0_i32_0 : i32, i32
  }
  func.func @transform_6(%arg0: i32) -> (i32, i32) {
    %c0_i32 = arith.constant 0 : i32
    %c0_i32_0 = arith.constant 0 : i32
    %c0_i32_1 = arith.constant 0 : i32
    return %c0_i32, %c0_i32_0 : i32, i32
  }
  func.func @transform_7(%arg0: i32) -> (i32, i32) {
    %c0_i32 = arith.constant 0 : i32
    %c0_i32_0 = arith.constant 0 : i32
    %c0_i32_1 = arith.constant 0 : i32
    return %c0_i32, %c0_i32_0 : i32, i32
  }
  func.func @transform_8(%arg0: i32) -> (i32, i32) {
    %c0_i32 = arith.constant 0 : i32
    %c0_i32_0 = arith.constant 0 : i32
    %c0_i32_1 = arith.constant 0 : i32
    return %c0_i32, %c0_i32_0 : i32, i32
  }
  func.func @transform_9(%arg0: i32) -> (i32, i32) {
    %c0_i32 = arith.constant 0 : i32
    %c0_i32_0 = arith.constant 0 : i32
    return %arg0, %c0_i32 : i32, i32
  }
}

</mosaic_0001>

<bundles_post_ra>
// kernel: tpu_custom_call.1
= control target key start
LH: loop header
LB: loop body
LE: loop exit
PB: predicated region body
PF: predicated region fallthrough
CT: control target
= control target key end

     0   :  { %vm50_vm0 = vcmask 130048   ;;  %s480_s0 = inlined_call_operand.vmem [shape: f32[8,32], index: 0, kind: input, shape index: {}]   ;;  %s481_s1 = inlined_call_operand.vmem [shape: f32[8,16], index: 1, kind: input, shape index: {}]   ;;  %s482_s2 = inlined_call_operand.vmem [shape: bf16[32,128], index: 2, kind: input, shape index: {}]   ;;  %s483_s3 = inlined_call_operand.vmem [shape: bf16[16,128], index: 3, kind: input, shape index: {}]   ;;  %s484_s4 = inlined_call_operand.vmem [shape: f32[1,128], index: 4, kind: input, shape index: {}]   ;;  %s485_s5 = inlined_call_operand.vmem [shape: bf16[128,64], index: 5, kind: input, shape index: {}]   ;;  %s486_s6 = inlined_call_operand.vmem [shape: f32[1,64], index: 6, kind: input, shape index: {}]   ;;  %s487_s7 = inlined_call_operand.vmem [shape: bf16[64,32], index: 7, kind: input, shape index: {}]   ;;  %s488_s8 = inlined_call_operand.vmem [shape: f32[1,32], index: 8, kind: input, shape index: {}]   ;;  %s489_s9 = inlined_call_operand.hbm [shape: f32[8,32], index: 9, kind: output, shape index: {}]  }
   0x1   :  { %v321_v0 = vld [vmem:[%s483_s3] sm:$0xff]  ;;  %v320_v1 = vld [vmem:[%s482_s2 + $0x8] sm:$0xff]  ;;  %v329_v4 = vld [vmem:[%s485_s5 + $0x38] sm:$0xff] }
   0x2   :  { %v36_v2 = vld [vmem:[%s481_s1] sm:$0xff]  ;;  %61 = vmatpush.bf16.msra.mxu0 %v321_v0  ;;  %89 = vmatpush.bf16.msra.mxu1 %v320_v1  ;;  %v328_v7 = vld [vmem:[%s485_s5 + $0x30] sm:$0xff] }
   0x3   :  { %v37_v3 = vpack.c.bf16 %v36_v2, %v36_v2  ;;  %v319_v5 = vld [vmem:[%s482_s2] sm:$0xff]  ;;  %171 = vmatpush.bf16.msra.mxu2 %v329_v4 }
   0x4   :  { %v34_v6 = vld [vmem:[%s480_s0] sm:$0xff] }
   0x5   :  { %14 = vsyncpa [#allocation3], 0  ;;  %260 = vmatmul.msk.bf16.vlgmr.msra.gmra.mxu0 %vm50_vm0, %v37_v3  ;;  %v35_v8 = vpack.c.bf16 %v34_v6, %v34_v6  ;;  %vm79_vm1 = vcmask 261120   ;;  %v327_v9 = vld [vmem:[%s485_s5 + $0x28] sm:$0xff]  ;;  %v326_v10 = vld [vmem:[%s485_s5 + $0x20] sm:$0xff]  ;;  %vm222_vm2 = vcmask 523264  }
   0x6   :  { %90 = vmatpush.bf16.msra.mxu1 %v319_v5  ;;  %v325_v11 = vld [vmem:[%s485_s5 + $0x18] sm:$0xff]  ;;  %v324_v12 = vld [vmem:[%s485_s5 + $0x10] sm:$0xff]  ;;  %v323_v13 = vld [vmem:[%s485_s5 + $0x8] sm:$0xff]  ;;  %s364_s21 = smov [#allocation2]   ;;  %s247_s2 = sshll.u32 %s489_s9, 4  ;;  %s248_s2 = int_to_ptr.hbm [resolvable:$true] %s247_s2 }
   0x7   :  { %172 = vmatpush.bf16.msra.mxu2 %v328_v7  ;;  %v322_v14 = vld [vmem:[%s485_s5] sm:$0xff]  ;;  %v333_v15 = vld [vmem:[%s487_s7 + $0x18] sm:$0xff]  ;;  %v332_v16 = vld [vmem:[%s487_s7 + $0x10] sm:$0xff]  ;;  %s245_s1 = sshll.u32 %s364_s21, 4  ;;  %s246_s1 = int_to_ptr.vmem [resolvable:$true] %s245_s1 }
   0x8   :  { %230 = vmatpush.bf16.msra.mxu3 %v333_v15  ;;  %v335_v18 = vld [vmem:[%s484_s4] ss:$0 sm:$0xff]  ;;  %v331_v26 = vld [vmem:[%s487_s7 + $0x8] sm:$0xff] }
   0x9   :  { %269 = vmatmul.msk.bf16.vlgmr.msra.gmra.mxu1 %vm79_vm1, %v35_v8  ;;  %v330_v27 = vld [vmem:[%s487_s7] sm:$0xff] }
   0xa   :  { %v336_v28 = vld [vmem:[%s486_s6] ss:$0 sm:$0xff] }
   0xb   :  { %173 = vmatpush.bf16.msra.mxu2 %v327_v9  ;;  %v337_v34 = vld [vmem:[%s488_s8] ss:$0 sm:$0xff] }
   0xc   :  { %231 = vmatpush.bf16.msra.mxu3 %v332_v16 }
   0xf   :  { %174 = vmatpush.bf16.msra.mxu2 %v326_v10 }
  0x10   :  { %232 = vmatpush.bf16.msra.mxu3 %v331_v26 }
  0x13   :  { %175 = vmatpush.bf16.msra.mxu2 %v325_v11 }
  0x14   :  { %233 = vmatpush.bf16.msra.mxu3 %v330_v27 }
  0x17   :  { %176 = vmatpush.bf16.msra.mxu2 %v324_v12 }
  0x1b   :  { %177 = vmatpush.bf16.msra.mxu2 %v323_v13 }
  0x1f   :  { %178 = vmatpush.bf16.msra.mxu2 %v322_v14 }
  0x82   :  { %v63_v17 = vpop.f32.mrf.mxu0 }
  0x86   :  { %v92_v19 = vpop.f32.mrf.mxu1 }
  0x87   :  { %v93_v20 = vadd.f32 %v92_v19, %v63_v17 }
  0x89   :  { %v100_v21 = vadd.f32 %v335_v18, %v93_v20 }
  0x8a   :  { %v65_v22 = vpop.f32.mrf.mxu0 }
  0x8b   :  { %v101_v23 = vmax.f32 %v100_v21, 0.0 }
  0x8d   :  { %v102_v24 = vpack.c.bf16 %v101_v23, %v101_v23 }
  0x8e   :  { %v94_v25 = vpop.f32.mrf.mxu1 }
  0x8f   :  { %179 = vmatmul.bf16.vlgmr.msra.gmra.mxu2 %v102_v24 }
 0x112   :  { %v180_v29 = vpop.f32.mrf.mxu2 }
 0x113   :  { %v181_v30 = vadd.f32 %v336_v28, %v180_v29 }
 0x115   :  { %v184_v31 = vmax.f32 %v181_v30, 0.0 }
 0x117   :  { %v185_v32 = vpack.c.bf16 %v184_v31, %v184_v31 }
 0x119   :  { %318 = vmatmul.msk.bf16.vlgmr.msra.gmra.mxu3 %vm222_vm2, %v185_v32 }
 0x11a   :  { %v182_v33 = vpop.f32.mrf.mxu2 }
 0x19c   :  { %v235_v35 = vpop.f32.mrf.mxu3 }
 0x19d   :  { %v236_v36 = vadd.f32 %v337_v34, %v235_v35 }
 0x19f   :  { %239 = vst.msk [vmem:[#allocation2] sm:$0xff] %vm79_vm1, %v236_v36 }
 0x1a0   :  { %250 = dma.vmem_to_hbm [thread:$0]  %s246_s1, 128, %s248_s2, [#allocation3]  }
 0x1a4   :  { %v237_v37 = vpop.f32.mrf.mxu3 }
 0x1a5   :  { %362 = dma.done.wait [#allocation3], 128  }
 0x1a6   :  { %363 = vsyncadd [#allocation3], 4294967168 }
 0x1a7   :  { %255 = vsyncpa [#allocation3], 1 }

</bundles_post_ra>
